<compile_context>
chip_gen: v7x
topology: tpu7x:2x2x1
jax: 0.10.0
libtpu: 0.0.40
codegen_flags: <defaults>
</compile_context>

<pallas_src>
import functools

import jax
import jax.numpy as jnp
from jax import lax
from jax.experimental import pallas as pl
from jax.experimental.pallas import tpu as pltpu


def _conv_relu_pool_kernel(x_ref, w_ref, o_ref, *, C_out, K, P, Hp, Wp, Wg, out_w):
    """One batch element: fused conv (VALID, stride 1) -> maxpool(PxP, floor) -> ReLU.

    x_ref: (P*P, C_in, Hg*Wg)  space-to-depth input; plane pi*P+pj holds
                               x[ci, P*r+pi, P*s+pj] at flat position r*Wg + s.
    w_ref: (C_out, K*K*C_in)   conv weight; column (kh*K + kw)*C_in + ci.
    o_ref: (C_out, out_w)      pooled output; column i*Wg + j (only j < Wp valid),
                               zero-padded to out_w lanes (multiple of 128).
    """
    Lg = (Hp - 1) * Wg + Wp          # per-offset RHS width (row-wrap columns are garbage)
    w = w_ref[...]
    pooled = None
    for di in range(P):
        for dj in range(P):
            # Assemble the (K*K*C_in, Lg) patch matrix for this pool offset from
            # K*K static, contiguous slices of the space-to-depth input (VMEM only).
            taps = []
            for kh in range(K):
                for kw in range(K):
                    u, v = di + kh, dj + kw
                    plane = (u % P) * P + (v % P)
                    start = (u // P) * Wg + (v // P)
                    taps.append(x_ref[plane, :, start:start + Lg])     # (C_in, Lg)
            rhs = jnp.concatenate(taps, axis=0)                        # (K*K*C_in, Lg)
            # One MXU matmul per pool offset; f32 accumulation.
            acc = jnp.dot(w, rhs, preferred_element_type=jnp.float32)  # (C_out, Lg)
            # Every offset's accumulator starts at lane 0 -> pool-max is a free vmax.
            pooled = acc if pooled is None else jnp.maximum(pooled, acc)
    pooled = jnp.maximum(pooled, 0.0)             # ReLU last (max and ReLU commute)
    pad = out_w - Lg
    if pad:                                       # pad to a full 128-multiple lane tile
        pooled = jnp.concatenate(
            [pooled, jnp.zeros((C_out, pad), pooled.dtype)], axis=-1)
    o_ref[...] = pooled.astype(o_ref.dtype)       # full-tile, unmasked store


def conv_block_forward(x, weight, pool_size=2, compute_dtype=None):
    """ConvBlock forward.  x: (N, C_in, H, W) NCHW, weight: (C_out, C_in, K, K)."""
    N, C_in, H, W = x.shape
    C_out, C_in_w, K, K_w = weight.shape
    assert C_in == C_in_w and K == K_w
    P = pool_size
    Ho, Wo = H - K + 1, W - K + 1            # VALID conv, stride 1
    Hp, Wp = Ho // P, Wo // P                # MaxPool2d floor mode
    assert Hp > 0 and Wp > 0

    # Space-to-depth geometry: every (pool offset, conv tap) pair becomes a contiguous
    # window of one "pool-phase plane", so the kernel needs no strided reads/reshapes.
    g = (P + K - 2) // P                     # extra pooled rows/cols a tap shift can reach
    Hg, Wg = Hp + g, Wp + g
    Hs, Ws = Hg * P, Wg * P                  # input rows/cols consumed (pad values unused)

    # --- prologue: 1x-data layout op on x (no K^2-inflated im2col written to HBM) ------
    pad_h, pad_w = max(0, Hs - H), max(0, Ws - W)
    xp = jnp.pad(x, ((0, 0), (0, 0), (0, pad_h), (0, pad_w))) if (pad_h or pad_w) else x
    xp = xp[:, :, :Hs, :Ws]
    # xs[n, pi*P+pj, ci, r*Wg+s] = x[n, ci, P*r+pi, P*s+pj]
    xs = (xp.reshape(N, C_in, Hg, P, Wg, P)
            .transpose(0, 3, 5, 1, 2, 4)
            .reshape(N, P * P, C_in, Hg * Wg))

    # w_mat[co, (kh*K+kw)*C_in + ci] = weight[co, ci, kh, kw]
    w_mat = jnp.transpose(weight, (0, 2, 3, 1)).reshape(C_out, K * K * C_in)

    if compute_dtype is not None:            # bf16 operands at non-toy sizes
        xs = xs.astype(compute_dtype)
        w_mat = w_mat.astype(compute_dtype)

    Lg = (Hp - 1) * Wg + Wp
    out_w = max(128, ((Hp * Wg + 127) // 128) * 128)   # lane-dense output width

    kernel = functools.partial(
        _conv_relu_pool_kernel,
        C_out=C_out, K=K, P=P, Hp=Hp, Wp=Wp, Wg=Wg, out_w=out_w)

    flops = 2 * N * (P * P) * C_out * (K * K * C_in) * Lg
    bytes_accessed = (xs.dtype.itemsize * xs.size
                      + w_mat.dtype.itemsize * w_mat.size
                      + x.dtype.itemsize * N * C_out * out_w)

    out = pl.pallas_call(
        kernel,
        out_shape=jax.ShapeDtypeStruct((N, C_out, out_w), x.dtype),
        grid=(N,),
        in_specs=[
            pl.BlockSpec((pl.Squeezed(), P * P, C_in, Hg * Wg),
                         lambda n: (n, 0, 0, 0)),
            pl.BlockSpec((C_out, K * K * C_in), lambda n: (0, 0)),
        ],
        out_specs=pl.BlockSpec((pl.Squeezed(), C_out, out_w), lambda n: (n, 0, 0)),
        compiler_params=pltpu.CompilerParams(
            dimension_semantics=("parallel",)),
        cost_estimate=pl.CostEstimate(
            flops=flops, transcendentals=0, bytes_accessed=bytes_accessed),
    )(xs, w_mat)

    # Kernel columns are laid out as q = i*Wg + j (j < Wp valid); drop pad/garbage cols.
    out = out[:, :, :Hp * Wg].reshape(N, C_out, Hp, Wg)[:, :, :, :Wp]
    return out                              # (N, C_out, Hp, Wp)


def reference(x, weight, pool_size):
    """Pure-XLA reference with identical semantics (for verification)."""
    conv = lax.conv_general_dilated(
        x, weight, window_strides=(1, 1), padding="VALID",
        dimension_numbers=("NCHW", "OIHW", "NCHW"),
        precision=lax.Precision.HIGHEST)
    r = jnp.maximum(conv, 0.0)
    return lax.reduce_window(
        r, -jnp.inf, lax.max,
        window_dimensions=(1, 1, pool_size, pool_size),
        window_strides=(1, 1, pool_size, pool_size),
        padding="VALID")


if __name__ == "__main__":
    # ConvBlock(num_inp_channels=4, num_out_fmaps=8, kernel_size=3, pool_size=2)
    N, C_in, H, W = 2, 4, 16, 16
    C_out, K, P = 8, 3, 2

    key = jax.random.PRNGKey(0)
    kx, kw = jax.random.split(key)
    x = jax.random.normal(kx, (N, C_in, H, W), dtype=jnp.float32)
    # Deterministic Kaiming-like init for the bias-free Conv2d weight.
    fan_in = C_in * K * K
    weight = jax.random.normal(kw, (C_out, C_in, K, K), dtype=jnp.float32) / jnp.sqrt(
        jnp.float32(fan_in))

    fwd = jax.jit(functools.partial(conv_block_forward, pool_size=P))
    out = jax.block_until_ready(fwd(x, weight))
    ref = jax.block_until_ready(reference(x, weight, P))

    expected_shape = (N, C_out, (H - K + 1) // P, (W - K + 1) // P)  # (2, 8, 7, 7)
    assert out.shape == expected_shape, (out.shape, expected_shape)
    assert out.dtype == jnp.float32
    max_err = float(jnp.max(jnp.abs(out - ref)))
    assert jnp.allclose(out, ref, atol=1e-4, rtol=1e-4), f"max abs err {max_err}"

    print("KERNEL_OK")
</pallas_src>

<mosaic_0001>
module attributes {stable_mosaic.version = 11 : i64} {
  func.func @_conv_relu_pool_kernel(%arg0: i32, %arg1: memref<1x4x4x64xf32, #tpu.memory_space<vmem>>, %arg2: memref<8x36xf32, #tpu.memory_space<vmem>>, %arg3: memref<1x8x128xf32, #tpu.memory_space<vmem>>) attributes {dimension_semantics = [#tpu.dimension_semantics<parallel>], iteration_bounds = array<i64: 2>, scalar_prefetch = 0 : i64, scratch_operands = 0 : i64, tpu.core_type = #tpu.core_type<tc>, window_params = [{transform_indices = @transform_0, window_bounds = array<i64: 1, 4, 4, 64>}, {pipeline_mode = #tpu.pipeline_mode<synchronous>, transform_indices = @transform_1, window_bounds = array<i64: 8, 36>}, {transform_indices = @transform_2, window_bounds = array<i64: 1, 8, 128>}]} {
    %c0 = arith.constant 0 : index
    %c0_0 = arith.constant 0 : index
    %0 = vector.load %arg2[%c0, %c0_0] : memref<8x36xf32, #tpu.memory_space<vmem>>, vector<8x36xf32>
    %c0_1 = arith.constant 0 : index
    %c0_2 = arith.constant 0 : index
    %c0_3 = arith.constant 0 : index
    %c0_4 = arith.constant 0 : index
    %1 = vector.load %arg1[%c0_1, %c0_2, %c0_3, %c0_4] : memref<1x4x4x64xf32, #tpu.memory_space<vmem>>, vector<1x1x4x55xf32>
    %2 = vector.shape_cast %1 : vector<1x1x4x55xf32> to vector<4x55xf32>
    %c0_5 = arith.constant 0 : index
    %c1 = arith.constant 1 : index
    %c0_6 = arith.constant 0 : index
    %c0_7 = arith.constant 0 : index
    %3 = vector.load %arg1[%c0_5, %c1, %c0_6, %c0_7] : memref<1x4x4x64xf32, #tpu.memory_space<vmem>>, vector<1x1x4x55xf32>
    %4 = vector.shape_cast %3 : vector<1x1x4x55xf32> to vector<4x55xf32>
    %c0_8 = arith.constant 0 : index
    %c0_9 = arith.constant 0 : index
    %c0_10 = arith.constant 0 : index
    %c1_11 = arith.constant 1 : index
    %5 = vector.load %arg1[%c0_8, %c0_9, %c0_10, %c1_11] : memref<1x4x4x64xf32, #tpu.memory_space<vmem>>, vector<1x1x4x55xf32>
    %6 = vector.shape_cast %5 : vector<1x1x4x55xf32> to vector<4x55xf32>
    %c0_12 = arith.constant 0 : index
    %c2 = arith.constant 2 : index
    %c0_13 = arith.constant 0 : index
    %c0_14 = arith.constant 0 : index
    %7 = vector.load %arg1[%c0_12, %c2, %c0_13, %c0_14] : memref<1x4x4x64xf32, #tpu.memory_space<vmem>>, vector<1x1x4x55xf32>
    %8 = vector.shape_cast %7 : vector<1x1x4x55xf32> to vector<4x55xf32>
    %c0_15 = arith.constant 0 : index
    %c3 = arith.constant 3 : index
    %c0_16 = arith.constant 0 : index
    %c0_17 = arith.constant 0 : index
    %9 = vector.load %arg1[%c0_15, %c3, %c0_16, %c0_17] : memref<1x4x4x64xf32, #tpu.memory_space<vmem>>, vector<1x1x4x55xf32>
    %10 = vector.shape_cast %9 : vector<1x1x4x55xf32> to vector<4x55xf32>
    %c0_18 = arith.constant 0 : index
    %c2_19 = arith.constant 2 : index
    %c0_20 = arith.constant 0 : index
    %c1_21 = arith.constant 1 : index
    %11 = vector.load %arg1[%c0_18, %c2_19, %c0_20, %c1_21] : memref<1x4x4x64xf32, #tpu.memory_space<vmem>>, vector<1x1x4x55xf32>
    %12 = vector.shape_cast %11 : vector<1x1x4x55xf32> to vector<4x55xf32>
    %c0_22 = arith.constant 0 : index
    %c0_23 = arith.constant 0 : index
    %c0_24 = arith.constant 0 : index
    %c8 = arith.constant 8 : index
    %13 = vector.load %arg1[%c0_22, %c0_23, %c0_24, %c8] : memref<1x4x4x64xf32, #tpu.memory_space<vmem>>, vector<1x1x4x55xf32>
    %14 = vector.shape_cast %13 : vector<1x1x4x55xf32> to vector<4x55xf32>
    %c0_25 = arith.constant 0 : index
    %c1_26 = arith.constant 1 : index
    %c0_27 = arith.constant 0 : index
    %c8_28 = arith.constant 8 : index
    %15 = vector.load %arg1[%c0_25, %c1_26, %c0_27, %c8_28] : memref<1x4x4x64xf32, #tpu.memory_space<vmem>>, vector<1x1x4x55xf32>
    %16 = vector.shape_cast %15 : vector<1x1x4x55xf32> to vector<4x55xf32>
    %c0_29 = arith.constant 0 : index
    %c0_30 = arith.constant 0 : index
    %c0_31 = arith.constant 0 : index
    %c9 = arith.constant 9 : index
    %17 = vector.load %arg1[%c0_29, %c0_30, %c0_31, %c9] : memref<1x4x4x64xf32, #tpu.memory_space<vmem>>, vector<1x1x4x55xf32>
    %18 = vector.shape_cast %17 : vector<1x1x4x55xf32> to vector<4x55xf32>
    %19 = tpu.concatenate %2, %4, %6, %8, %10, %12, %14, %16, %18 in 0 : vector<4x55xf32>, vector<4x55xf32>, vector<4x55xf32>, vector<4x55xf32>, vector<4x55xf32>, vector<4x55xf32>, vector<4x55xf32>, vector<4x55xf32>, vector<4x55xf32> -> vector<36x55xf32>
    %cst = arith.constant dense<0.000000e+00> : vector<8x55xf32>
    %20 = tpu.matmul %0, %19, %cst {dimension_numbers = #tpu.dot_dimension_numbers<[1], [0], [0], [1], [0, 0, 1, 1], [], []>} : vector<8x36xf32>, vector<36x55xf32>, vector<8x55xf32> -> vector<8x55xf32>
    %c0_32 = arith.constant 0 : index
    %c1_33 = arith.constant 1 : index
    %c0_34 = arith.constant 0 : index
    %c0_35 = arith.constant 0 : index
    %21 = vector.load %arg1[%c0_32, %c1_33, %c0_34, %c0_35] : memref<1x4x4x64xf32, #tpu.memory_space<vmem>>, vector<1x1x4x55xf32>
    %22 = vector.shape_cast %21 : vector<1x1x4x55xf32> to vector<4x55xf32>
    %c0_36 = arith.constant 0 : index
    %c0_37 = arith.constant 0 : index
    %c0_38 = arith.constant 0 : index
    %c1_39 = arith.constant 1 : index
    %23 = vector.load %arg1[%c0_36, %c0_37, %c0_38, %c1_39] : memref<1x4x4x64xf32, #tpu.memory_space<vmem>>, vector<1x1x4x55xf32>
    %24 = vector.shape_cast %23 : vector<1x1x4x55xf32> to vector<4x55xf32>
    %c0_40 = arith.constant 0 : index
    %c1_41 = arith.constant 1 : index
    %c0_42 = arith.constant 0 : index
    %c1_43 = arith.constant 1 : index
    %25 = vector.load %arg1[%c0_40, %c1_41, %c0_42, %c1_43] : memref<1x4x4x64xf32, #tpu.memory_space<vmem>>, vector<1x1x4x55xf32>
    %26 = vector.shape_cast %25 : vector<1x1x4x55xf32> to vector<4x55xf32>
    %c0_44 = arith.constant 0 : index
    %c3_45 = arith.constant 3 : index
    %c0_46 = arith.constant 0 : index
    %c0_47 = arith.constant 0 : index
    %27 = vector.load %arg1[%c0_44, %c3_45, %c0_46, %c0_47] : memref<1x4x4x64xf32, #tpu.memory_space<vmem>>, vector<1x1x4x55xf32>
    %28 = vector.shape_cast %27 : vector<1x1x4x55xf32> to vector<4x55xf32>
    %c0_48 = arith.constant 0 : index
    %c2_49 = arith.constant 2 : index
    %c0_50 = arith.constant 0 : index
    %c1_51 = arith.constant 1 : index
    %29 = vector.load %arg1[%c0_48, %c2_49, %c0_50, %c1_51] : memref<1x4x4x64xf32, #tpu.memory_space<vmem>>, vector<1x1x4x55xf32>
    %30 = vector.shape_cast %29 : vector<1x1x4x55xf32> to vector<4x55xf32>
    %c0_52 = arith.constant 0 : index
    %c3_53 = arith.constant 3 : index
    %c0_54 = arith.constant 0 : index
    %c1_55 = arith.constant 1 : index
    %31 = vector.load %arg1[%c0_52, %c3_53, %c0_54, %c1_55] : memref<1x4x4x64xf32, #tpu.memory_space<vmem>>, vector<1x1x4x55xf32>
    %32 = vector.shape_cast %31 : vector<1x1x4x55xf32> to vector<4x55xf32>
    %c0_56 = arith.constant 0 : index
    %c1_57 = arith.constant 1 : index
    %c0_58 = arith.constant 0 : index
    %c8_59 = arith.constant 8 : index
    %33 = vector.load %arg1[%c0_56, %c1_57, %c0_58, %c8_59] : memref<1x4x4x64xf32, #tpu.memory_space<vmem>>, vector<1x1x4x55xf32>
    %34 = vector.shape_cast %33 : vector<1x1x4x55xf32> to vector<4x55xf32>
    %c0_60 = arith.constant 0 : index
    %c0_61 = arith.constant 0 : index
    %c0_62 = arith.constant 0 : index
    %c9_63 = arith.constant 9 : index
    %35 = vector.load %arg1[%c0_60, %c0_61, %c0_62, %c9_63] : memref<1x4x4x64xf32, #tpu.memory_space<vmem>>, vector<1x1x4x55xf32>
    %36 = vector.shape_cast %35 : vector<1x1x4x55xf32> to vector<4x55xf32>
    %c0_64 = arith.constant 0 : index
    %c1_65 = arith.constant 1 : index
    %c0_66 = arith.constant 0 : index
    %c9_67 = arith.constant 9 : index
    %37 = vector.load %arg1[%c0_64, %c1_65, %c0_66, %c9_67] : memref<1x4x4x64xf32, #tpu.memory_space<vmem>>, vector<1x1x4x55xf32>
    %38 = vector.shape_cast %37 : vector<1x1x4x55xf32> to vector<4x55xf32>
    %39 = tpu.concatenate %22, %24, %26, %28, %30, %32, %34, %36, %38 in 0 : vector<4x55xf32>, vector<4x55xf32>, vector<4x55xf32>, vector<4x55xf32>, vector<4x55xf32>, vector<4x55xf32>, vector<4x55xf32>, vector<4x55xf32>, vector<4x55xf32> -> vector<36x55xf32>
    %cst_68 = arith.constant dense<0.000000e+00> : vector<8x55xf32>
    %40 = tpu.matmul %0, %39, %cst_68 {dimension_numbers = #tpu.dot_dimension_numbers<[1], [0], [0], [1], [0, 0, 1, 1], [], []>} : vector<8x36xf32>, vector<36x55xf32>, vector<8x55xf32> -> vector<8x55xf32>
    %41 = arith.maximumf %20, %40 : vector<8x55xf32>
    %c0_69 = arith.constant 0 : index
    %c2_70 = arith.constant 2 : index
    %c0_71 = arith.constant 0 : index
    %c0_72 = arith.constant 0 : index
    %42 = vector.load %arg1[%c0_69, %c2_70, %c0_71, %c0_72] : memref<1x4x4x64xf32, #tpu.memory_space<vmem>>, vector<1x1x4x55xf32>
    %43 = vector.shape_cast %42 : vector<1x1x4x55xf32> to vector<4x55xf32>
    %c0_73 = arith.constant 0 : index
    %c3_74 = arith.constant 3 : index
    %c0_75 = arith.constant 0 : index
    %c0_76 = arith.constant 0 : index
    %44 = vector.load %arg1[%c0_73, %c3_74, %c0_75, %c0_76] : memref<1x4x4x64xf32, #tpu.memory_space<vmem>>, vector<1x1x4x55xf32>
    %45 = vector.shape_cast %44 : vector<1x1x4x55xf32> to vector<4x55xf32>
    %c0_77 = arith.constant 0 : index
    %c2_78 = arith.constant 2 : index
    %c0_79 = arith.constant 0 : index
    %c1_80 = arith.constant 1 : index
    %46 = vector.load %arg1[%c0_77, %c2_78, %c0_79, %c1_80] : memref<1x4x4x64xf32, #tpu.memory_space<vmem>>, vector<1x1x4x55xf32>
    %47 = vector.shape_cast %46 : vector<1x1x4x55xf32> to vector<4x55xf32>
    %c0_81 = arith.constant 0 : index
    %c0_82 = arith.constant 0 : index
    %c0_83 = arith.constant 0 : index
    %c8_84 = arith.constant 8 : index
    %48 = vector.load %arg1[%c0_81, %c0_82, %c0_83, %c8_84] : memref<1x4x4x64xf32, #tpu.memory_space<vmem>>, vector<1x1x4x55xf32>
    %49 = vector.shape_cast %48 : vector<1x1x4x55xf32> to vector<4x55xf32>
    %c0_85 = arith.constant 0 : index
    %c1_86 = arith.constant 1 : index
    %c0_87 = arith.constant 0 : index
    %c8_88 = arith.constant 8 : index
    %50 = vector.load %arg1[%c0_85, %c1_86, %c0_87, %c8_88] : memref<1x4x4x64xf32, #tpu.memory_space<vmem>>, vector<1x1x4x55xf32>
    %51 = vector.shape_cast %50 : vector<1x1x4x55xf32> to vector<4x55xf32>
    %c0_89 = arith.constant 0 : index
    %c0_90 = arith.constant 0 : index
    %c0_91 = arith.constant 0 : index
    %c9_92 = arith.constant 9 : index
    %52 = vector.load %arg1[%c0_89, %c0_90, %c0_91, %c9_92] : memref<1x4x4x64xf32, #tpu.memory_space<vmem>>, vector<1x1x4x55xf32>
    %53 = vector.shape_cast %52 : vector<1x1x4x55xf32> to vector<4x55xf32>
    %c0_93 = arith.constant 0 : index
    %c2_94 = arith.constant 2 : index
    %c0_95 = arith.constant 0 : index
    %c8_96 = arith.constant 8 : index
    %54 = vector.load %arg1[%c0_93, %c2_94, %c0_95, %c8_96] : memref<1x4x4x64xf32, #tpu.memory_space<vmem>>, vector<1x1x4x55xf32>
    %55 = vector.shape_cast %54 : vector<1x1x4x55xf32> to vector<4x55xf32>
    %c0_97 = arith.constant 0 : index
    %c3_98 = arith.constant 3 : index
    %c0_99 = arith.constant 0 : index
    %c8_100 = arith.constant 8 : index
    %56 = vector.load %arg1[%c0_97, %c3_98, %c0_99, %c8_100] : memref<1x4x4x64xf32, #tpu.memory_space<vmem>>, vector<1x1x4x55xf32>
    %57 = vector.shape_cast %56 : vector<1x1x4x55xf32> to vector<4x55xf32>
    %c0_101 = arith.constant 0 : index
    %c2_102 = arith.constant 2 : index
    %c0_103 = arith.constant 0 : index
    %c9_104 = arith.constant 9 : index
    %58 = vector.load %arg1[%c0_101, %c2_102, %c0_103, %c9_104] : memref<1x4x4x64xf32, #tpu.memory_space<vmem>>, vector<1x1x4x55xf32>
    %59 = vector.shape_cast %58 : vector<1x1x4x55xf32> to vector<4x55xf32>
    %60 = tpu.concatenate %43, %45, %47, %49, %51, %53, %55, %57, %59 in 0 : vector<4x55xf32>, vector<4x55xf32>, vector<4x55xf32>, vector<4x55xf32>, vector<4x55xf32>, vector<4x55xf32>, vector<4x55xf32>, vector<4x55xf32>, vector<4x55xf32> -> vector<36x55xf32>
    %cst_105 = arith.constant dense<0.000000e+00> : vector<8x55xf32>
    %61 = tpu.matmul %0, %60, %cst_105 {dimension_numbers = #tpu.dot_dimension_numbers<[1], [0], [0], [1], [0, 0, 1, 1], [], []>} : vector<8x36xf32>, vector<36x55xf32>, vector<8x55xf32> -> vector<8x55xf32>
    %62 = arith.maximumf %41, %61 : vector<8x55xf32>
    %c0_106 = arith.constant 0 : index
    %c3_107 = arith.constant 3 : index
    %c0_108 = arith.constant 0 : index
    %c0_109 = arith.constant 0 : index
    %63 = vector.load %arg1[%c0_106, %c3_107, %c0_108, %c0_109] : memref<1x4x4x64xf32, #tpu.memory_space<vmem>>, vector<1x1x4x55xf32>
    %64 = vector.shape_cast %63 : vector<1x1x4x55xf32> to vector<4x55xf32>
    %c0_110 = arith.constant 0 : index
    %c2_111 = arith.constant 2 : index
    %c0_112 = arith.constant 0 : index
    %c1_113 = arith.constant 1 : index
    %65 = vector.load %arg1[%c0_110, %c2_111, %c0_112, %c1_113] : memref<1x4x4x64xf32, #tpu.memory_space<vmem>>, vector<1x1x4x55xf32>
    %66 = vector.shape_cast %65 : vector<1x1x4x55xf32> to vector<4x55xf32>
    %c0_114 = arith.constant 0 : index
    %c3_115 = arith.constant 3 : index
    %c0_116 = arith.constant 0 : index
    %c1_117 = arith.constant 1 : index
    %67 = vector.load %arg1[%c0_114, %c3_115, %c0_116, %c1_117] : memref<1x4x4x64xf32, #tpu.memory_space<vmem>>, vector<1x1x4x55xf32>
    %68 = vector.shape_cast %67 : vector<1x1x4x55xf32> to vector<4x55xf32>
    %c0_118 = arith.constant 0 : index
    %c1_119 = arith.constant 1 : index
    %c0_120 = arith.constant 0 : index
    %c8_121 = arith.constant 8 : index
    %69 = vector.load %arg1[%c0_118, %c1_119, %c0_120, %c8_121] : memref<1x4x4x64xf32, #tpu.memory_space<vmem>>, vector<1x1x4x55xf32>
    %70 = vector.shape_cast %69 : vector<1x1x4x55xf32> to vector<4x55xf32>
    %c0_122 = arith.constant 0 : index
    %c0_123 = arith.constant 0 : index
    %c0_124 = arith.constant 0 : index
    %c9_125 = arith.constant 9 : index
    %71 = vector.load %arg1[%c0_122, %c0_123, %c0_124, %c9_125] : memref<1x4x4x64xf32, #tpu.memory_space<vmem>>, vector<1x1x4x55xf32>
    %72 = vector.shape_cast %71 : vector<1x1x4x55xf32> to vector<4x55xf32>
    %c0_126 = arith.constant 0 : index
    %c1_127 = arith.constant 1 : index
    %c0_128 = arith.constant 0 : index
    %c9_129 = arith.constant 9 : index
    %73 = vector.load %arg1[%c0_126, %c1_127, %c0_128, %c9_129] : memref<1x4x4x64xf32, #tpu.memory_space<vmem>>, vector<1x1x4x55xf32>
    %74 = vector.shape_cast %73 : vector<1x1x4x55xf32> to vector<4x55xf32>
    %c0_130 = arith.constant 0 : index
    %c3_131 = arith.constant 3 : index
    %c0_132 = arith.constant 0 : index
    %c8_133 = arith.constant 8 : index
    %75 = vector.load %arg1[%c0_130, %c3_131, %c0_132, %c8_133] : memref<1x4x4x64xf32, #tpu.memory_space<vmem>>, vector<1x1x4x55xf32>
    %76 = vector.shape_cast %75 : vector<1x1x4x55xf32> to vector<4x55xf32>
    %c0_134 = arith.constant 0 : index
    %c2_135 = arith.constant 2 : index
    %c0_136 = arith.constant 0 : index
    %c9_137 = arith.constant 9 : index
    %77 = vector.load %arg1[%c0_134, %c2_135, %c0_136, %c9_137] : memref<1x4x4x64xf32, #tpu.memory_space<vmem>>, vector<1x1x4x55xf32>
    %78 = vector.shape_cast %77 : vector<1x1x4x55xf32> to vector<4x55xf32>
    %c0_138 = arith.constant 0 : index
    %c3_139 = arith.constant 3 : index
    %c0_140 = arith.constant 0 : index
    %c9_141 = arith.constant 9 : index
    %79 = vector.load %arg1[%c0_138, %c3_139, %c0_140, %c9_141] : memref<1x4x4x64xf32, #tpu.memory_space<vmem>>, vector<1x1x4x55xf32>
    %80 = vector.shape_cast %79 : vector<1x1x4x55xf32> to vector<4x55xf32>
    %81 = tpu.concatenate %64, %66, %68, %70, %72, %74, %76, %78, %80 in 0 : vector<4x55xf32>, vector<4x55xf32>, vector<4x55xf32>, vector<4x55xf32>, vector<4x55xf32>, vector<4x55xf32>, vector<4x55xf32>, vector<4x55xf32>, vector<4x55xf32> -> vector<36x55xf32>
    %cst_142 = arith.constant dense<0.000000e+00> : vector<8x55xf32>
    %82 = tpu.matmul %0, %81, %cst_142 {dimension_numbers = #tpu.dot_dimension_numbers<[1], [0], [0], [1], [0, 0, 1, 1], [], []>} : vector<8x36xf32>, vector<36x55xf32>, vector<8x55xf32> -> vector<8x55xf32>
    %83 = arith.maximumf %62, %82 : vector<8x55xf32>
    %cst_143 = arith.constant 0.000000e+00 : f32
    %84 = vector.broadcast %cst_143 : f32 to vector<8x55xf32>
    %85 = arith.maximumf %83, %84 : vector<8x55xf32>
    %cst_144 = arith.constant 0.000000e+00 : f32
    %86 = vector.broadcast %cst_144 : f32 to vector<8x73xf32>
    %87 = tpu.concatenate %85, %86 in 1 : vector<8x55xf32>, vector<8x73xf32> -> vector<8x128xf32>
    %c0_145 = arith.constant 0 : index
    %c0_146 = arith.constant 0 : index
    %c0_147 = arith.constant 0 : index
    %88 = vector.load %arg3[%c0_145, %c0_146, %c0_147] : memref<1x8x128xf32, #tpu.memory_space<vmem>>, vector<1x8x128xf32>
    %89 = vector.shape_cast %88 : vector<1x8x128xf32> to vector<8x128xf32>
    %90 = vector.shape_cast %87 : vector<8x128xf32> to vector<1x8x128xf32>
    tpu.vector_store %arg3[%c0_145, %c0_146, %c0_147], %90 {strides = array<i32>} : memref<1x8x128xf32, #tpu.memory_space<vmem>>, vector<1x8x128xf32>,
    return
  }
  func.func @transform_0(%arg0: i32) -> (i32, i32, i32, i32) {
    %c0_i32 = arith.constant 0 : i32
    %c0_i32_0 = arith.constant 0 : i32
    %c0_i32_1 = arith.constant 0 : i32
    %c0_i32_2 = arith.constant 0 : i32
    return %arg0, %c0_i32, %c0_i32_0, %c0_i32_1 : i32, i32, i32, i32
  }
  func.func @transform_1(%arg0: i32) -> (i32, i32) {
    %c0_i32 = arith.constant 0 : i32
    %c0_i32_0 = arith.constant 0 : i32
    %c0_i32_1 = arith.constant 0 : i32
    return %c0_i32, %c0_i32_0 : i32, i32
  }
  func.func @transform_2(%arg0: i32) -> (i32, i32, i32) {
    %c0_i32 = arith.constant 0 : i32
    %c0_i32_0 = arith.constant 0 : i32
    %c0_i32_1 = arith.constant 0 : i32
    return %arg0, %c0_i32, %c0_i32_0 : i32, i32, i32
  }
}

</mosaic_0001>

<bundles_post_ra>
// kernel: conv_block_forward.1
= control target key start
LH: loop header
LB: loop body
LE: loop exit
PB: predicated region body
PF: predicated region fallthrough
CT: control target
= control target key end

     0   :  { %s788_s9 = smov 0   ;;  %s854_s0 = inlined_call_operand.vmem [shape: f32[2,4,4,64], index: 0, kind: input, shape index: {}]   ;;  %s855_s1 = inlined_call_operand.vmem [shape: f32[8,36], index: 1, kind: input, shape index: {}]   ;;  %s856_s2 = inlined_call_operand.vmem [shape: f32[2,8,128], index: 2, kind: output, shape index: {}]  }
   0x1 LB: > { %s588_s10 = sadd.s32 4294967295, %s765_s9   ;;  %p592_p0 = scmp.ge.s32.totalorder %s765_s9, 1  ;;  %s765_s9 = sphi %s788_s9, %s12_s9  }
   0x2   : > { %p112_p1 = scmp.lt.s32.totalorder %s765_s9, 3 }
   0x4   : > { %p113_p2 = pnand %p592_p0, %p112_p1 }
   0x5   : > { %p133_p3 = scmp.lt.s32.totalorder (!%p113_p2), %s588_s10, 1  ;;  %v767_v0 = vmov (!%p113_p2), 0.0|0.0   ;;  %vm171_vm0 = vcmask (!%p113_p2), 1043456   ;;  %s768_s15 = smov (!%p113_p2), 120   ;;  %vm770_vm1 = vmmov (!%p113_p2), 0   ;;  %v771_v14 = vmov (!%p113_p2), 0.0  }
   0x6   : > { %116 = sbr.rel (%p113_p2) target bundleno = 384 (0x180), region = 28  ;;  %686 = vmatprep.subr.bf16.mxu0 (!%p113_p2), %v767_v0  ;;  %692 = vmatprep.subr.bf16.mxu1 (!%p113_p2), %v767_v0  ;;  %s769_s16 = smov (!%p113_p2), 127   ;;  %v142_v48 = vld [vmem:[%s855_s1] sm:$0xff] (!%p113_p2)  ;;  %vm176_vm2 = vcmask (!%p113_p2), 293888   ;;  %vm532_vm3 = vcmask (!%p113_p2), 449536  }
   0x7   : > { %644 = vmatprep.mubr.msk.f32.mxu0 (!%p113_p2), %vm770_vm1, %v771_v14  ;;  %657 = vmatprep.mubr.msk.f32.mxu1 (!%p113_p2), %vm770_vm1, %v771_v14  ;;  %s772_s17 = smov (!%p113_p2), 119  }
   0xd   : > { %s858_s10 = smov (!%p133_p3, %s588_s10), 1 }
   0xe   : > { %s609_s11 = sshll.u32 %s858_s10, 4  ;;  %s595_s20 = sshll.u32 %s858_s10, 3 }
   0xf   : > { %s137_s14 = scalar_lea.vmem %s854_s0, %s609_s11  ;;  %s141_s23 = scalar_lea.vmem %s856_s2, %s595_s20 }
  0x10   : > { %v143_v1 = vld [vmem:[%s137_s14] sm:$0xf]  ;;  %v596_v2 = vld [vmem:[%s137_s14 + $0x4] sm:$0xf]  ;;  %v598_v3 = vld [vmem:[%s137_s14 + $0xc] sm:$0xf] }
  0x11   : > { %v151_v4 = vrot.slane %v596_v2, 4  ;;  %v252_v5 = vrot.slane %v143_v1, 4  ;;  %v597_v6 = vld [vmem:[%s137_s14 + $0x8] sm:$0xf]  ;;  %v260_v7 = vrot.slane %v598_v3, 4 }
  0x12   : > { %v158_v8 = vrot.slane %v597_v6, 4 }
  0x13   : > { %v734_v9 = vpack.i.bf16 %v151_v4, %v143_v1  ;;  %v724_v10 = vpack.i.bf16 %v252_v5, %v143_v1  ;;  %v172_v11 = vsel %vm171_vm0, %v143_v1, %v151_v4  ;;  %v739_v12 = vpack.i.bf16 %v260_v7, %v597_v6 }
  0x14   : > { %v729_v13 = vpack.i.bf16 %v158_v8, %v596_v2  ;;  %v744_v15 = vpack.i.bf16 %v252_v5, %v596_v2  ;;  %v754_v16 = vpack.i.bf16 %v158_v8, %v151_v4  ;;  %v364_v41 = vsel %vm171_vm0, %v597_v6, %v260_v7 }
  0x15   : > { %735 = vrot.lane.b32.xlu1 %v734_v9, %s768_s15  ;;  %725 = vrot.lane.b32.xlu0 %v724_v10, %s769_s16 }
  0x19   : > { %740 = vrot.lane.b32.xlu1 %v739_v12, %s769_s16  ;;  %730 = vrot.lane.b32.xlu0 %v729_v13, %s769_s16 }
  0x1d   : > { %271 = vrot.lane.b32.xlu1 %v252_v5, %s772_s17  ;;  %745 = vrot.lane.b32.xlu0 %v744_v15, %s768_s15 }
  0x21   : > { %440 = vrot.lane.b32.xlu1 %v598_v3, %s769_s16  ;;  %169 = vrot.lane.b32.xlu0 %v143_v1, %s772_s17 }
  0x25   : > { %750 = vrot.lane.b32.xlu1 %v739_v12, %s768_s15  ;;  %274 = vrot.lane.b32.xlu0 %v596_v2, %s772_s17 }
  0x29   : > { %755 = vrot.lane.b32.xlu0 %v754_v16, %s772_s17  ;;  %447 = vrot.lane.b32.xlu1 %v598_v3, %s768_s15 }
  0x2d   : > { %362 = vrot.lane.b32.xlu0 %v597_v6, %s772_s17  ;;  %453 = vrot.lane.b32.xlu1 %v598_v3, %s772_s17 }
  0x87   : > { %v736_v17 = vpop.permute.xlu1 %735  ;;  %v726_v18 = vpop.permute.xlu0 %725 }
  0x88   : > { %v727_v19 = vunpack.i.l.bf16 %v726_v18  ;;  %v738_v20 = vunpack.i.h.bf16 %v736_v17  ;;  %v737_v21 = vunpack.i.l.bf16 %v736_v17  ;;  %v728_v22 = vunpack.i.h.bf16 %v726_v18 }
  0x8a   : > { %v173_v23 = vsel %vm171_vm0, %v727_v19, %v158_v8  ;;  %v175_v29 = vsel %vm171_vm0, %v737_v21, %v738_v20  ;;  %v276_v30 = vsel %vm171_vm0, %v596_v2, %v728_v22 }
  0x8b   : > { %v741_v24 = vpop.permute.xlu1 %740  ;;  %v731_v25 = vpop.permute.xlu0 %730  ;;  %v687_v26 = vpack.c.bf16 %v173_v23, %v172_v11 }
  0x8c   : > { %v733_v27 = vunpack.i.h.bf16 %v731_v25  ;;  %v732_v28 = vunpack.i.l.bf16 %v731_v25  ;;  %v743_v31 = vunpack.i.h.bf16 %v741_v24  ;;  %v742_v32 = vunpack.i.l.bf16 %v741_v24 }
  0x8d   : > { %688 = vmatpush3.bf16.msra.mxu0 %v687_v26 }
  0x8e   : > { %689 = vmatprep.subr.bf16.mxu0 %v767_v0  ;;  %v174_v33 = vsel %vm171_vm0, %v598_v3, %v733_v27  ;;  %v277_v34 = vsel %vm171_vm0, %v732_v28, %v260_v7  ;;  %v278_v43 = vsel %vm171_vm0, %v742_v32, %v743_v31 }
  0x8f   : > { %v272_v35 = vpop.permute.xlu1 %271  ;;  %v746_v36 = vpop.permute.xlu0 %745  ;;  %v690_v37 = vpack.c.bf16 %v175_v29, %v174_v33  ;;  %v693_v38 = vpack.c.bf16 %v277_v34, %v276_v30 }
  0x90   : > { %v748_v39 = vunpack.i.h.bf16 %v746_v36  ;;  %v747_v40 = vunpack.i.l.bf16 %v746_v36 }
  0x91   : > { %691 = vmatpush3.bf16.msra.mxu0 %v690_v37  ;;  %694 = vmatpush3.bf16.msra.mxu1 %v693_v38 }
  0x92   : > { %v365_v42 = vsel %vm171_vm0, %v742_v32, %v748_v39  ;;  %642 = vmatprep.subr.mxu0 %v771_v14  ;;  %695 = vmatprep.subr.bf16.mxu1 %v767_v0  ;;  %v279_v44 = vsel %vm171_vm0, %v747_v40, %v272_v35 }
  0x93   : > { %v441_v45 = vpop.permute.xlu1 %440  ;;  %v170_v46 = vpop.permute.xlu0 %169  ;;  %v696_v47 = vpack.c.bf16 %v279_v44, %v278_v43  ;;  %v699_v49 = vpack.c.bf16 %v365_v42, %v364_v41 }
  0x94   : > { %v455_v50 = vsel %vm171_vm0, %v441_v45, %v738_v20 }
  0x95   : > { %643 = vmatpush3.msk.msra.mxu0 %vm171_vm0, %v170_v46  ;;  %697 = vmatpush3.bf16.msra.mxu1 %v696_v47  ;;  %v705_v55 = vpack.c.bf16 %v455_v50, %v174_v33 }
  0x96   : > { %698 = vmatprep.subr.bf16.mxu0 %v767_v0  ;;  %645 = vmatmul.mubr.msk.f32.vlgmr.msra.gmra.mrb[0].mxu0 %vm176_vm2, %v142_v48 }
  0x97   : > { %v751_v51 = vpop.permute.xlu1 %750  ;;  %v275_v52 = vpop.permute.xlu0 %274  ;;  %700 = vmatpush3.bf16.msra.mxu0 %v699_v49  ;;  %655 = vmatprep.subr.mxu1 %v771_v14 }
  0x98   : > { %v753_v53 = vunpack.i.h.bf16 %v751_v51  ;;  %v752_v54 = vunpack.i.l.bf16 %v751_v51  ;;  %701 = vmatprep.subr.bf16.mxu0 %v767_v0  ;;  %670 = vmatprep.mubr.msk.f32.mxu0 %vm770_vm1, %v771_v14 }
  0x99   : > { %656 = vmatpush3.msk.msra.mxu1 %vm171_vm0, %v275_v52 }
  0x9a   : > { %v366_v56 = vsel %vm171_vm0, %v752_v54, %v753_v53  ;;  %704 = vmatprep.subr.bf16.mxu1 %v767_v0  ;;  %658 = vmatmul.mubr.msk.f32.vlgmr.msra.gmra.mrb[0].mxu1 %vm176_vm2, %v142_v48 }
  0x9b   : > { %v702_v57 = vpack.c.bf16 %v366_v56, %v279_v44  ;;  %v756_v58 = vpop.permute.xlu0 %755  ;;  %706 = vmatpush3.bf16.msra.mxu1 %v705_v55  ;;  %v448_v59 = vpop.permute.xlu1 %447  ;;  %683 = vmatprep.mubr.msk.f32.mxu1 %vm770_vm1, %v771_v14 }
  0x9c   : > { %v758_v60 = vunpack.i.h.bf16 %v756_v58  ;;  %v757_v61 = vunpack.i.l.bf16 %v756_v58  ;;  %707 = vmatprep.subr.bf16.mxu1 %v767_v0 }
  0x9d   : > { %703 = vmatpush3.bf16.msra.mxu0 %v702_v57 }
  0x9e   : > { %v456_v62 = vsel %vm171_vm0, %v170_v46, %v757_v61  ;;  %v457_v63 = vsel %vm171_vm0, %v448_v59, %v758_v60  ;;  %668 = vmatprep.subr.mxu0 %v771_v14 }
  0x9f   : > { %v708_v1 = vpack.c.bf16 %v457_v63, %v456_v62  ;;  %v363_v2 = vpop.permute.xlu0 %362  ;;  %v454_v3 = vpop.permute.xlu1 %453 }
  0xa1   : > { %669 = vmatpush3.msk.msra.mxu0 %vm171_vm0, %v363_v2  ;;  %709 = vmatpush3.bf16.msra.mxu1 %v708_v1 }
  0xa2   : > { %671 = vmatmul.mubr.msk.f32.vlgmr.msra.gmra.mrb[2].mxu0 %vm176_vm2, %v142_v48  ;;  %681 = vmatprep.subr.mxu1 %v771_v14 }
  0xa5   : > { %682 = vmatpush3.msk.msra.mxu1 %vm171_vm0, %v454_v3 }
  0xa6   : > { %684 = vmatmul.mubr.msk.f32.vlgmr.msra.gmra.mrb[2].mxu1 %vm176_vm2, %v142_v48 }
 0x169   : > { %v248_v0 = vpop.f32.mrb[0].mxu0 }
 0x16a   : > { %v646_v4 = vpop.f32.mrb[1].mxu0 }
 0x16d   : > { %v348_v5 = vpop.f32.mrb[0].mxu1 }
 0x16e   : > { %v352_v6 = vmax.f32 %v248_v0, %v348_v5  ;;  %v659_v7 = vpop.f32.mrb[1].mxu1 }
 0x175   : > { %v435_v8 = vpop.f32.mrb[2].mxu0 }
 0x176   : > { %v439_v9 = vmax.f32 %v352_v6, %v435_v8  ;;  %v672_v10 = vpop.f32.mrb[3].mxu0 }
 0x179   : > { %v526_v11 = vpop.f32.mrb[2].mxu1 }
 0x17a   : > { %v530_v12 = vmax.f32 %v439_v9, %v526_v11  ;;  %v685_v13 = vpop.f32.mrb[3].mxu1 }
 0x17c   : > { %v531_v14 = vmax.f32 %v530_v12, 0.0 }
 0x17e   : > { %v533_v15 = vsel %vm532_vm3, %v531_v14, 0.0 }
 0x17f   : > { %534 = vst [vmem:[%s141_s23] sm:$0xff] %v533_v15 }
 0x180 PF: > { %s12_s9 = sadd.s32 1, %s765_s9  }
 0x181   : > { %p9_p4 = scmp.ge.s32.totalorder %s12_s9, 4  }
 0x183   :  { %11 = sbr.rel (!%p9_p4) target bundleno = 1 (0x1), region = 61 }

</bundles_post_ra>
